<compile_context>
chip_gen: v5e
topology: v5e:2x2
jax: 0.10.0
libtpu: 0.0.40
codegen_flags: <defaults>
</compile_context>

<pallas_src>
import functools

import jax
import jax.numpy as jnp
from jax.experimental import pallas as pl
from jax.experimental.pallas import tpu as pltpu


# ------------------------------- helpers ------------------------------------

_MAX_TM = 512                       # batch tile cap
_MAX_TK = 2048                      # K-chunk cap (ksplit variant)
_RESIDENT_W_MAX_BYTES = 8 * 1024 * 1024
_VMEM_BUDGET = 28 * 1024 * 1024     # conservative: fits every TPU generation
_VMEM_LIMIT_CAP = 48 * 1024 * 1024  # < v7x's 64 MiB physical VMEM


def _cdiv(a: int, b: int) -> int:
    return (a + b - 1) // b


def _round_up(n: int, m: int) -> int:
    return _cdiv(n, m) * m


def _vmem_limit(est_bytes: int) -> int:
    """Explicit scoped-VMEM limit: estimate * 1.4 + 1 MiB headroom, clamped."""
    return int(min(max(est_bytes * 14 // 10 + (1 << 20), 16 * 1024 * 1024),
                   _VMEM_LIMIT_CAP))


def _choose_tm(batch: int, bytes_per_row: int, fixed_bytes: int) -> int:
    """Sublane-aligned batch tile that fits the VMEM budget."""
    b8 = _round_up(max(batch, 1), 8)
    tm = min(_MAX_TM, b8)
    # >= 2 batch tiles once the batch is big enough (megacore sharding on v7x).
    if b8 > 256:
        tm = min(tm, _round_up(_cdiv(b8, 2), 8))
    while tm > 8 and fixed_bytes + tm * bytes_per_row > _VMEM_BUDGET:
        tm = max(8, _round_up(tm // 2, 8))
    return tm


def _choose_tn(c_pad: int) -> int:
    if c_pad <= 1024:
        return c_pad
    for cand in (512, 384, 256, 128):
        if c_pad % cand == 0:
            return cand
    return 128  # unreachable: c_pad is a multiple of 128


# ------------------------------- kernels ------------------------------------

def _lr_kernel_resident(x_ref, wt_ref, b_ref, o_ref):
    """One batch tile vs. the full VMEM-resident W^T (D, C_pad). No K reduction."""
    x = x_ref[...].astype(wt_ref.dtype)            # bf16 cast on VMEM data (VPU)
    acc = jnp.dot(x, wt_ref[...], preferred_element_type=jnp.float32)
    o_ref[...] = b_ref[...] + acc                   # (1,C) broadcasts over rows


def _lr_kernel_ksplit(x_ref, wt_ref, b_ref, o_ref):
    """(tm, tn) output tile; K reduction over grid axis 2, accumulating directly
    into the f32 output block (VMEM-resident: its (i, j) index is constant in k)."""
    k = pl.program_id(2)

    @pl.when(k == 0)
    def _():
        # Initialize with the bias -> no epilogue add/copy, no scratch accumulator.
        o_ref[...] = jnp.broadcast_to(b_ref[...], o_ref.shape)

    x = x_ref[...].astype(wt_ref.dtype)
    o_ref[...] += jnp.dot(x, wt_ref[...], preferred_element_type=jnp.float32)


# ------------------------------ forward calls --------------------------------

@functools.partial(jax.jit,
                   static_argnames=("tm", "num_classes", "vmem_limit"))
def _forward_resident(x, wt, b2, *, tm, num_classes, vmem_limit):
    batch, d = x.shape
    d_w, c_pad = wt.shape
    m_pad = _round_up(batch, tm)
    if m_pad != batch:                       # only pad when the tile demands it
        x = jnp.pad(x, ((0, m_pad - batch), (0, 0)))

    out = pl.pallas_call(
        _lr_kernel_resident,
        out_shape=jax.ShapeDtypeStruct((m_pad, c_pad), jnp.float32),
        grid_spec=pltpu.PrefetchScalarGridSpec(
            num_scalar_prefetch=0,
            grid=(m_pad // tm,),
            in_specs=[
                pl.BlockSpec((tm, d), lambda i: (i, 0)),        # x batch tile
                pl.BlockSpec((d_w, c_pad), lambda i: (0, 0)),   # full W^T, resident
                pl.BlockSpec((1, c_pad), lambda i: (0, 0)),     # bias, resident
            ],
            out_specs=pl.BlockSpec((tm, c_pad), lambda i: (i, 0)),
        ),
        compiler_params=pltpu.CompilerParams(
            dimension_semantics=("parallel",),
            vmem_limit_bytes=vmem_limit,
        ),
    )(x, wt, b2)
    return out[:batch, :num_classes]


@functools.partial(jax.jit,
                   static_argnames=("tm", "tk", "tn", "num_classes", "vmem_limit"))
def _forward_ksplit(x, wt, b2, *, tm, tk, tn, num_classes, vmem_limit):
    batch, d = x.shape
    d_pad, c_pad = wt.shape
    m_pad = _round_up(batch, tm)
    if (m_pad, d_pad) != (batch, d):         # D padded only to a 128-multiple
        x = jnp.pad(x, ((0, m_pad - batch), (0, d_pad - d)))

    out = pl.pallas_call(
        _lr_kernel_ksplit,
        out_shape=jax.ShapeDtypeStruct((m_pad, c_pad), jnp.float32),
        grid_spec=pltpu.PrefetchScalarGridSpec(
            num_scalar_prefetch=0,
            grid=(m_pad // tm, c_pad // tn, d_pad // tk),
            in_specs=[
                pl.BlockSpec((tm, tk), lambda i, j, k: (i, k)),  # x tile
                pl.BlockSpec((tk, tn), lambda i, j, k: (k, j)),  # W^T tile (bf16)
                pl.BlockSpec((1, tn), lambda i, j, k: (0, j)),   # bias tile
            ],
            out_specs=pl.BlockSpec((tm, tn), lambda i, j, k: (i, j)),
        ),
        compiler_params=pltpu.CompilerParams(
            dimension_semantics=("parallel", "parallel", "arbitrary"),
            vmem_limit_bytes=vmem_limit,
        ),
    )(x, wt, b2)
    return out[:batch, :num_classes]


# ------------------------------- module wrapper ------------------------------

class PallasLR:
    """LR module: prepares (transposes / pads / bf16-casts) parameters ONCE at
    construction and binds the tiling choice to them; __call__ only runs the
    Pallas forward."""

    def __init__(self, weight, bias, *, weight_dtype=jnp.bfloat16,
                 force_ksplit: bool = False):
        weight = jnp.asarray(weight)
        bias = jnp.asarray(bias)
        c, d = weight.shape
        self.num_classes = int(c)
        self.input_size = int(d)
        c_pad = _round_up(c, 128)
        self.c_pad = c_pad

        itemsize = jnp.dtype(weight_dtype).itemsize
        w_bytes = d * c_pad * itemsize
        if (not force_ksplit) and w_bytes <= _RESIDENT_W_MAX_BYTES:
            self.variant = "resident"
            self.tk = None
            self.tn = c_pad
            d_pad = d                      # no K padding at all on the fast path
        else:
            self.variant = "ksplit"
            d128 = _round_up(d, 128)
            nk = _cdiv(d128, _MAX_TK)
            self.tk = _round_up(_cdiv(d128, nk), 128)
            self.tn = _choose_tn(c_pad)
            d_pad = self.tk * nk
        self.d_pad = d_pad

        wt = jnp.zeros((d_pad, c_pad), dtype=weight_dtype)
        wt = wt.at[:d, :c].set(weight.T.astype(weight_dtype))
        b2 = jnp.zeros((1, c_pad), dtype=jnp.float32)
        b2 = b2.at[0, :c].set(bias.astype(jnp.float32))
        self.wt = wt
        self.b2 = b2

    def __call__(self, x):
        x = jnp.asarray(x)
        orig_shape = x.shape
        if x.ndim != 2:                     # nn.Linear accepts leading batch dims
            x = x.reshape(-1, self.input_size)
        assert x.shape[1] == self.input_size
        batch = x.shape[0]
        itemsize = self.wt.dtype.itemsize

        if self.variant == "resident":
            d, c_pad = self.wt.shape
            bytes_per_row = 2 * 4 * (d + c_pad)            # x + out, double-buffered
            fixed = 2 * d * c_pad * itemsize + 2 * 4 * c_pad
            tm = _choose_tm(batch, bytes_per_row, fixed)
            out = _forward_resident(
                x, self.wt, self.b2, tm=tm, num_classes=self.num_classes,
                vmem_limit=_vmem_limit(fixed + tm * bytes_per_row))
        else:
            tk, tn = self.tk, self.tn
            bytes_per_row = 2 * 4 * (tk + tn)
            fixed = 2 * tk * tn * itemsize + 2 * 4 * tn
            tm = _choose_tm(batch, bytes_per_row, fixed)
            out = _forward_ksplit(
                x, self.wt, self.b2, tm=tm, tk=tk, tn=tn,
                num_classes=self.num_classes,
                vmem_limit=_vmem_limit(fixed + tm * bytes_per_row))

        if len(orig_shape) != 2:
            out = out.reshape(*orig_shape[:-1], self.num_classes)
        return out


def lr_forward(x, weight, bias, *, weight_dtype=jnp.bfloat16):
    """One-shot convenience (re-prepares parameters every call).
    For repeated calls with fixed parameters, build PallasLR once and reuse it."""
    return PallasLR(weight, bias, weight_dtype=weight_dtype)(x)


# ----------------------------------- demo ------------------------------------

if __name__ == "__main__":
    key = jax.random.PRNGKey(0)
    kx, kw, kb = jax.random.split(key, 3)

    batch = 8
    input_size = 32
    num_classes = 4

    x = jax.random.normal(kx, (batch, input_size), dtype=jnp.float32)
    # Deterministic init mimicking nn.Linear's uniform(-1/sqrt(D), 1/sqrt(D)).
    bound = 1.0 / jnp.sqrt(jnp.float32(input_size))
    weight = jax.random.uniform(kw, (num_classes, input_size),
                                minval=-bound, maxval=bound, dtype=jnp.float32)
    bias = jax.random.uniform(kb, (num_classes,),
                              minval=-bound, maxval=bound, dtype=jnp.float32)

    ref = x @ weight.T + bias

    # 1) Fast path: VMEM-resident W, bf16 weights (default configuration).
    model = PallasLR(weight, bias)
    out = model(x)
    jax.block_until_ready(out)
    assert out.shape == (batch, num_classes)
    assert jnp.allclose(out, ref, atol=1e-2, rtol=1e-2)

    # 2) Same path with f32 weights -> matches the f32 reference tightly.
    out_f32 = PallasLR(weight, bias, weight_dtype=jnp.float32)(x)
    jax.block_until_ready(out_f32)
    assert jnp.allclose(out_f32, ref, atol=1e-5, rtol=1e-5)

    # 3) Exercise the large-D K-split path at the same small shape.
    out_ks = PallasLR(weight, bias, force_ksplit=True)(x)
    jax.block_until_ready(out_ks)
    assert jnp.allclose(out_ks, ref, atol=1e-2, rtol=1e-2)

    print("KERNEL_OK")
</pallas_src>

<mosaic_0001>
module attributes {stable_mosaic.version = 11 : i64} {
  func.func @_lr_kernel_resident(%arg0: i32, %arg1: memref<8x32xf32, #tpu.memory_space<vmem>>, %arg2: memref<32x128xbf16, #tpu.memory_space<vmem>>, %arg3: memref<1x128xf32, #tpu.memory_space<vmem>>, %arg4: memref<8x128xf32, #tpu.memory_space<vmem>>) attributes {dimension_semantics = [#tpu.dimension_semantics<parallel>], iteration_bounds = array<i64: 1>, scalar_prefetch = 0 : i64, scratch_operands = 0 : i64, tpu.core_type = #tpu.core_type<tc>, window_params = [{transform_indices = @transform_0, window_bounds = array<i64: 8, 32>}, {pipeline_mode = #tpu.pipeline_mode<synchronous>, transform_indices = @transform_1, window_bounds = array<i64: 32, 128>}, {pipeline_mode = #tpu.pipeline_mode<synchronous>, transform_indices = @transform_2, window_bounds = array<i64: 1, 128>}, {transform_indices = @transform_3, window_bounds = array<i64: 8, 128>}]} {
    %c0 = arith.constant 0 : index
    %c0_0 = arith.constant 0 : index
    %0 = vector.load %arg1[%c0, %c0_0] : memref<8x32xf32, #tpu.memory_space<vmem>>, vector<8x32xf32>
    %1 = arith.truncf %0 : vector<8x32xf32> to vector<8x32xbf16>
    %c0_1 = arith.constant 0 : index
    %c0_2 = arith.constant 0 : index
    %2 = vector.load %arg2[%c0_1, %c0_2] : memref<32x128xbf16, #tpu.memory_space<vmem>>, vector<32x128xbf16>
    %cst = arith.constant dense<0.000000e+00> : vector<8x128xf32>
    %3 = tpu.matmul %1, %2, %cst {dimension_numbers = #tpu.dot_dimension_numbers<[1], [0], [0], [1], [0, 0, 1, 1], [], []>} : vector<8x32xbf16>, vector<32x128xbf16>, vector<8x128xf32> -> vector<8x128xf32>
    %c0_3 = arith.constant 0 : index
    %c0_4 = arith.constant 0 : index
    %4 = vector.load %arg3[%c0_3, %c0_4] : memref<1x128xf32, #tpu.memory_space<vmem>>, vector<1x128xf32>
    %5 = vector.broadcast %4 : vector<1x128xf32> to vector<8x128xf32>
    %6 = arith.addf %5, %3 : vector<8x128xf32>
    %c0_5 = arith.constant 0 : index
    %c0_6 = arith.constant 0 : index
    %7 = vector.load %arg4[%c0_5, %c0_6] : memref<8x128xf32, #tpu.memory_space<vmem>>, vector<8x128xf32>
    tpu.vector_store %arg4[%c0_5, %c0_6], %6 {strides = array<i32>} : memref<8x128xf32, #tpu.memory_space<vmem>>, vector<8x128xf32>,
    return
  }
  func.func @transform_0(%arg0: i32) -> (i32, i32) {
    %c0_i32 = arith.constant 0 : i32
    %c0_i32_0 = arith.constant 0 : i32
    return %arg0, %c0_i32 : i32, i32
  }
  func.func @transform_1(%arg0: i32) -> (i32, i32) {
    %c0_i32 = arith.constant 0 : i32
    %c0_i32_0 = arith.constant 0 : i32
    %c0_i32_1 = arith.constant 0 : i32
    return %c0_i32, %c0_i32_0 : i32, i32
  }
  func.func @transform_2(%arg0: i32) -> (i32, i32) {
    %c0_i32 = arith.constant 0 : i32
    %c0_i32_0 = arith.constant 0 : i32
    %c0_i32_1 = arith.constant 0 : i32
    return %c0_i32, %c0_i32_0 : i32, i32
  }
  func.func @transform_3(%arg0: i32) -> (i32, i32) {
    %c0_i32 = arith.constant 0 : i32
    %c0_i32_0 = arith.constant 0 : i32
    return %arg0, %c0_i32 : i32, i32
  }
}

</mosaic_0001>

<bundles_post_ra>
// kernel: _forward_resident.1
= control target key start
LH: loop header
LB: loop body
LE: loop exit
PB: predicated region body
PF: predicated region fallthrough
CT: control target
= control target key end

     0   :  { %8 = vsyncpa [#allocation3], 0  ;;  %s196_s0 = inlined_call_operand.hbm [shape: f32[8,32], index: 0, kind: input, shape index: {}]   ;;  %s197_s1 = inlined_call_operand.hbm [shape: bf16[32,128], index: 1, kind: input, shape index: {}]   ;;  %s198_s2 = inlined_call_operand.vmem [shape: f32[1,128], index: 2, kind: input, shape index: {}]   ;;  %s199_s3 = inlined_call_operand.vmem [shape: f32[8,128], index: 3, kind: output, shape index: {}]  }
   0x1   :  { %s15_s14 = sshll.u32 %s196_s0, 4  ;;  %s16_s14 = int_to_ptr.hbm [resolvable:$true] %s15_s14 }
   0x2   :  { %9 = vsyncpa [#allocation5], 0  ;;  %s160_s15 = smov [#allocation2]   ;;  %s25_s19 = sshll.u32 %s197_s1, 4  ;;  %s26_s19 = int_to_ptr.hbm [resolvable:$true] %s25_s19 }
   0x3   :  { %s17_s16 = sshll.u32 %s160_s15, 4  ;;  %s161_s20 = smov [#allocation4]   ;;  %s18_s16 = int_to_ptr.vmem [resolvable:$true] %s17_s16 }
   0x4   :  { %20 = dma.hbm_to_vmem [thread:$0]  %s16_s14, 128, %s18_s16, [#allocation3]  }
   0x5   :  { %s27_s21 = sshll.u32 %s161_s20, 4  ;;  %s162_s22 = smov 64   ;;  %s28_s21 = int_to_ptr.vmem [resolvable:$true] %s27_s21 }
   0x6   :  { %s163_s23 = smov 4  }
   0x7   :  { %33 = dma.hbm_to_vmem [thread:$0]  %s26_s19, 256, %s28_s21, [#allocation5], %s162_s22, %s162_s22, %s163_s23  }
   0x8   :  { %156 = dma.done.wait [#allocation3], 128  }
   0x9   :  { %157 = vsyncadd [#allocation3], 4294967168 }
   0xa   :  { %158 = dma.done.wait [#allocation5], 256  }
   0xb   :  { %159 = vsyncadd [#allocation5], 4294967040  ;;  %v102_v0 = vld [vmem:[#allocation4 + $0x8] sm:$0xff]  ;;  %v101_v1 = vld [vmem:[#allocation4] sm:$0xff]  ;;  %vm63_vm0 = vcmask 261120  }
   0xc   :  { %73 = vmatpush.bf16.msra.mxu0 %v102_v0  ;;  %v45_v2 = vld [vmem:[#allocation2] sm:$0xff] }
   0xd   :  { %v46_v3 = vpack.c.bf16 %v45_v2, %v45_v2  ;;  %v107_v4 = vld [vmem:[%s198_s2] ss:$0 sm:$0xff] }
  0x10   :  { %74 = vmatpush.bf16.msra.mxu0 %v101_v1 }
  0x13   :  { %100 = vmatmul.msk.bf16.vlgmr.msra.gmra.mxu0 %vm63_vm0, %v46_v3 }
  0x90   :  { %v76_v5 = vpop.f32.mrf.mxu0 }
  0x91   :  { %v84_v6 = vadd.f32 %v107_v4, %v76_v5 }
  0x93   :  { %85 = vst [vmem:[%s199_s3] sm:$0xff] %v84_v6 }
  0x98   :  { %v78_v7 = vpop.f32.mrf.mxu0 }
  0x99   :  { %90 = vsyncpa [#allocation3], 1 }
  0x9a   :  { %91 = vsyncpa [#allocation5], 1 }

</bundles_post_ra>
